<compile_context>
chip_gen: v5e
topology: v5e:2x2
jax: 0.10.0
libtpu: 0.0.40
codegen_flags: <defaults>
</compile_context>

<pallas_src>
import numpy as np
import jax
import jax.numpy as jnp
from jax import lax
from jax.experimental import pallas as pl
from jax.experimental.pallas import tpu as pltpu


_SUBLANE_BY_ITEMSIZE = {4: 8, 2: 16, 1: 32}   # sublane tile per element width


def _round_up(x, m):
    return ((x + m - 1) // m) * m


def _vmem_budgets():
    """(per-step tile budget, scoped-VMEM limit) — generation aware."""
    try:
        cap = int(pltpu.get_tpu_info().vmem_capacity_bytes)
    except Exception:
        cap = 128 << 20                      # conservative fallback (v5e/v6e sizing)
    if cap <= (64 << 20):                    # v7x: 64 MiB physical per TC
        return 8 << 20, 44 << 20
    # v5e / v6e: 128 MiB physical; explicit limit >> v5e's 16 MiB scoped default.
    return 4 << 20, 64 << 20


def _pixel_norm_3d(x3, eps, tile_budget, vmem_limit):
    """(B, C, HW) path: C on sublanes (reduced), flattened spatial on lanes."""
    B, C, HW = (int(d) for d in x3.shape)
    itemsize = x3.dtype.itemsize
    c_pad_in = _round_up(C, _SUBLANE_BY_ITEMSIZE.get(itemsize, 8))
    c_pad_f32 = _round_up(C, 8)

    def step_bytes(bt, hw_t):
        io = bt * c_pad_in * hw_t * itemsize   # one input tile (== one output tile)
        f32 = bt * c_pad_f32 * hw_t * 4        # in-kernel f32 upcast / squares
        return 2 * io + f32

    # Lane tile: multiple of 128 (full HW only when HW < 128), capped at 2048.
    if HW < 128:
        hw_t = HW
    else:
        hw_t = min(2048, 128 * (HW // 128))
        if step_bytes(1, hw_t) > tile_budget:
            # Even one batch row busts the budget (huge C*HW): shrink hw_t but keep
            # rows >= 512 lanes (>= 2 KiB f32 strided DMA rows) where possible.
            budget_chunks = max(1, tile_budget // max(1, step_bytes(1, 128)))
            n_chunks = min(hw_t // 128, max(budget_chunks, min(4, hw_t // 128)))
            hw_t = 128 * n_chunks

    per_b = step_bytes(1, hw_t)
    bt = int(max(1, min(B, tile_budget // max(1, per_b))))

    # v7x: make sure a large problem has >= 2 grid steps so both TCs get work.
    if pl.cdiv(B, bt) * pl.cdiv(HW, hw_t) == 1 and step_bytes(bt, hw_t) > (1 << 20):
        if B >= 2:
            bt = int(pl.cdiv(B, 2))
        elif hw_t >= 256:
            hw_t = 128 * int(pl.cdiv(hw_t // 128, 2))

    grid = (int(pl.cdiv(B, bt)), int(pl.cdiv(HW, hw_t)))
    inv_c = 1.0 / float(C)

    def kernel(x_ref, o_ref):
        # Split reads: the reduction pass and the apply pass each cast per-vreg,
        # so a full-tile f32 copy is never live across the reduction barrier.
        xs = x_ref[...].astype(jnp.float32)                  # (bt, C, hw_t)
        ss = jnp.sum(xs * xs, axis=1, keepdims=True)         # sublane reduce over C
        scale = lax.rsqrt(ss * inv_c + eps)                  # EUP
        o_ref[...] = (x_ref[...].astype(jnp.float32) * scale).astype(o_ref.dtype)

    cost = pl.CostEstimate(flops=3 * B * C * HW,
                           transcendentals=B * HW,
                           bytes_accessed=2 * B * C * HW * itemsize)
    return pl.pallas_call(
        kernel,
        out_shape=jax.ShapeDtypeStruct((B, C, HW), x3.dtype),
        grid=grid,
        in_specs=[pl.BlockSpec((bt, C, hw_t), lambda i, j: (i, 0, j))],
        out_specs=pl.BlockSpec((bt, C, hw_t), lambda i, j: (i, 0, j)),
        compiler_params=pltpu.CompilerParams(
            dimension_semantics=("parallel", "parallel"),
            vmem_limit_bytes=vmem_limit),
        cost_estimate=cost,
    )(x3)


def _pixel_norm_2d(x2, eps, tile_budget, vmem_limit):
    """(B, C) path (latents / HW==1): B on sublanes, C on lanes, lane reduction."""
    B, C = (int(d) for d in x2.shape)
    itemsize = x2.dtype.itemsize
    c_pad = _round_up(C, 128)

    def step_bytes(bt):
        return 2 * bt * c_pad * itemsize + bt * c_pad * 4

    bt = int(max(1, min(B, tile_budget // max(1, step_bytes(1)))))
    if bt < B:
        # (8,128) rule: sublane block dim must be a multiple of 8 or the full B.
        bt = min(B, max(8, (bt // 8) * 8))
    if pl.cdiv(B, bt) == 1 and step_bytes(bt) > (1 << 20) and B >= 16:
        bt = min(B, _round_up(int(pl.cdiv(B, 2)), 8))   # >= 2 steps for v7x

    grid = (int(pl.cdiv(B, bt)),)
    inv_c = 1.0 / float(C)

    def kernel(x_ref, o_ref):
        xs = x_ref[...].astype(jnp.float32)                  # (bt, C)
        ss = jnp.sum(xs * xs, axis=-1, keepdims=True)        # lane (XLU) reduce over C
        scale = lax.rsqrt(ss * inv_c + eps)
        o_ref[...] = (x_ref[...].astype(jnp.float32) * scale).astype(o_ref.dtype)

    cost = pl.CostEstimate(flops=3 * B * C,
                           transcendentals=B,
                           bytes_accessed=2 * B * C * itemsize)
    return pl.pallas_call(
        kernel,
        out_shape=jax.ShapeDtypeStruct((B, C), x2.dtype),
        grid=grid,
        in_specs=[pl.BlockSpec((bt, C), lambda i: (i, 0))],
        out_specs=pl.BlockSpec((bt, C), lambda i: (i, 0)),
        compiler_params=pltpu.CompilerParams(
            dimension_semantics=("parallel",),
            vmem_limit_bytes=vmem_limit),
        cost_estimate=cost,
    )(x2)


def pixel_norm(x, eps=1e-8):
    """PixelNorm over dim=1 of a (B, C, *spatial) array (matches the PyTorch module)."""
    if x.ndim < 2:
        raise ValueError("PixelNorm expects an input with at least (B, C) dims")
    orig_shape = x.shape
    B, C = int(orig_shape[0]), int(orig_shape[1])
    HW = int(np.prod(orig_shape[2:])) if x.ndim > 2 else 1
    tile_budget, vmem_limit = _vmem_budgets()
    if HW == 1:
        out = _pixel_norm_2d(x.reshape(B, C), eps, tile_budget, vmem_limit)
    else:
        out = _pixel_norm_3d(x.reshape(B, C, HW), eps, tile_budget, vmem_limit)
    return out.reshape(orig_shape)


if __name__ == "__main__":
    key = jax.random.PRNGKey(0)
    k1, k2, k3 = jax.random.split(key, 3)

    # (B, C, H, W) feature-map PixelNorm (the spec's typical use).
    B, C, H, W = 2, 4, 16, 16
    x = jax.random.normal(k1, (B, C, H, W), jnp.float32)
    out = jax.block_until_ready(pixel_norm(x))
    assert out.shape == (B, C, H, W) and out.dtype == x.dtype
    xf = np.asarray(x, np.float64)
    ref = xf / np.sqrt((xf ** 2).mean(axis=1, keepdims=True) + 1e-8)
    np.testing.assert_allclose(np.asarray(out), ref, rtol=1e-5, atol=1e-5)

    # (B, C) latent PixelNorm — exercises the lane-dense 2-D path.
    z = jax.random.normal(k2, (4, 512), jnp.float32)
    out2 = jax.block_until_ready(pixel_norm(z))
    zf = np.asarray(z, np.float64)
    ref2 = zf / np.sqrt((zf ** 2).mean(axis=1, keepdims=True) + 1e-8)
    np.testing.assert_allclose(np.asarray(out2), ref2, rtol=1e-5, atol=1e-5)

    # bf16 feature map — exercises the split-read f32-upcast path.
    xb = jax.random.normal(k3, (2, 8, 16, 16), jnp.bfloat16)
    out3 = jax.block_until_ready(pixel_norm(xb))
    xbf = np.asarray(jnp.asarray(xb, jnp.float32), np.float64)
    ref3 = xbf / np.sqrt((xbf ** 2).mean(axis=1, keepdims=True) + 1e-8)
    np.testing.assert_allclose(np.asarray(jnp.asarray(out3, jnp.float32), np.float64),
                               ref3, rtol=3e-2, atol=3e-2)

    print("KERNEL_OK")
</pallas_src>

<mosaic_0001>
module attributes {stable_mosaic.version = 11 : i64} {
  func.func @kernel(%arg0: i32, %arg1: i32, %arg2: memref<2x4x256xf32, #tpu.memory_space<vmem>>, %arg3: memref<2x4x256xf32, #tpu.memory_space<vmem>>) attributes {dimension_semantics = [#tpu.dimension_semantics<parallel>, #tpu.dimension_semantics<parallel>], iteration_bounds = array<i64: 1, 1>, scalar_prefetch = 0 : i64, scratch_operands = 0 : i64, tpu.core_type = #tpu.core_type<tc>, window_params = [{transform_indices = @transform_0, window_bounds = array<i64: 2, 4, 256>}, {transform_indices = @transform_1, window_bounds = array<i64: 2, 4, 256>}]} {
    %c0 = arith.constant 0 : index
    %c0_0 = arith.constant 0 : index
    %c0_1 = arith.constant 0 : index
    %0 = vector.load %arg2[%c0, %c0_0, %c0_1] : memref<2x4x256xf32, #tpu.memory_space<vmem>>, vector<2x4x256xf32>
    %1 = arith.mulf %0, %0 : vector<2x4x256xf32>
    %cst = arith.constant dense<0.000000e+00> : vector<2x256xf32>
    %2 = vector.multi_reduction <add>, %1, %cst [1] : vector<2x4x256xf32> to vector<2x256xf32>
    %3 = vector.shape_cast %2 : vector<2x256xf32> to vector<2x1x256xf32>
    %cst_2 = arith.constant 2.500000e-01 : f32
    %4 = vector.broadcast %cst_2 : f32 to vector<2x1x256xf32>
    %5 = arith.mulf %3, %4 : vector<2x1x256xf32>
    %cst_3 = arith.constant 9.99999993E-9 : f32
    %6 = vector.broadcast %cst_3 : f32 to vector<2x1x256xf32>
    %7 = arith.addf %5, %6 : vector<2x1x256xf32>
    %8 = math.rsqrt %7 : vector<2x1x256xf32>
    %c0_4 = arith.constant 0 : index
    %c0_5 = arith.constant 0 : index
    %c0_6 = arith.constant 0 : index
    %9 = vector.load %arg2[%c0_4, %c0_5, %c0_6] : memref<2x4x256xf32, #tpu.memory_space<vmem>>, vector<2x4x256xf32>
    %10 = vector.broadcast %8 : vector<2x1x256xf32> to vector<2x4x256xf32>
    %11 = arith.mulf %9, %10 : vector<2x4x256xf32>
    %c0_7 = arith.constant 0 : index
    %c0_8 = arith.constant 0 : index
    %c0_9 = arith.constant 0 : index
    %12 = vector.load %arg3[%c0_7, %c0_8, %c0_9] : memref<2x4x256xf32, #tpu.memory_space<vmem>>, vector<2x4x256xf32>
    tpu.vector_store %arg3[%c0_7, %c0_8, %c0_9], %11 {strides = array<i32>} : memref<2x4x256xf32, #tpu.memory_space<vmem>>, vector<2x4x256xf32>,
    return
  }
  func.func @transform_0(%arg0: i32, %arg1: i32) -> (i32, i32, i32) {
    %c0_i32 = arith.constant 0 : i32
    %c0_i32_0 = arith.constant 0 : i32
    return %arg0, %c0_i32, %arg1 : i32, i32, i32
  }
  func.func @transform_1(%arg0: i32, %arg1: i32) -> (i32, i32, i32) {
    %c0_i32 = arith.constant 0 : i32
    %c0_i32_0 = arith.constant 0 : i32
    return %arg0, %c0_i32, %arg1 : i32, i32, i32
  }
}

</mosaic_0001>

<bundles_post_ra>
// kernel: tpu_custom_call.1
= control target key start
LH: loop header
LB: loop body
LE: loop exit
PB: predicated region body
PF: predicated region fallthrough
CT: control target
= control target key end

     0   :  { %6 = vsyncpa [#allocation3], 0  ;;  %s258_s0 = inlined_call_operand.hbm [shape: f32[2,4,256], index: 0, kind: input, shape index: {}]   ;;  %s259_s1 = inlined_call_operand.hbm [shape: f32[2,4,256], index: 1, kind: output, shape index: {}]  }
   0x1   :  { %7 = vsyncpa [#allocation4], 0  ;;  %s12_s8 = sshll.u32 %s258_s0, 4  ;;  %s216_s9 = smov [#allocation2]   ;;  %s13_s8 = int_to_ptr.hbm [resolvable:$true] %s12_s8 }
   0x2   :  { %s14_s10 = sshll.u32 %s216_s9, 4  ;;  %s217_s11 = smov 128   ;;  %s15_s10 = int_to_ptr.vmem [resolvable:$true] %s14_s10 }
   0x3   :  { %s218_s12 = smov 8  }
   0x4   :  { %20 = dma.hbm_to_vmem [thread:$0]  %s13_s8, 256, %s15_s10, [#allocation3], %s217_s11, %s217_s11, %s218_s12  }
   0x5   :  { %212 = dma.done.wait [#allocation3], 256  }
   0x6   :  { %213 = vsyncadd [#allocation3], 4294967040  ;;  %v236_v0 = vld [vmem:[#allocation2] sm:$0xff]  ;;  %v238_v1 = vld [vmem:[#allocation2 + $0x8] sm:$0xff]  ;;  %vm42_vm0 = vcmask 1043456   ;;  %s219_s0 = smov [#allocation5]  }
   0x7   :  { %v27_v2 = vmul.f32 %v236_v0, %v236_v0  ;;  %v28_v3 = vmul.f32 %v238_v1, %v238_v1  ;;  %s137_s13 = sshll.u32 %s219_s0, 4  ;;  %s139_s16 = sshll.u32 %s259_s1, 4  ;;  %s138_s13 = int_to_ptr.vmem [resolvable:$true] %s137_s13  ;;  %s140_s16 = int_to_ptr.hbm [resolvable:$true] %s139_s16 }
   0x9   :  { %31 = vst [vmem:[#allocation1] ss:$2 sm:$0xff] %v27_v2 }
   0xa   :  { %35 = vst [vmem:[#allocation1 + $0x10] ss:$2 sm:$0xff] %v28_v3 }
  0x10   :  { %v32_v4 = vld.sshfl [vmem:[#allocation1] sm:$0xff pattern:$0x75316420]  ;;  %v33_v5 = vld.sshfl [vmem:[#allocation1 + $0x8] sm:$0xff pattern:$0x75316420] }
  0x11   :  { %v37_v6 = vld.sshfl [vmem:[#allocation1 + $0x18] sm:$0xff pattern:$0x75316420]  ;;  %v43_v7 = vsel %vm42_vm0, %v32_v4, 0.0  ;;  %v50_v8 = vsel %vm42_vm0, %v33_v5, 0.0 }
  0x12   :  { %v44_v9 = vrot.slane %v43_v7, 4  ;;  %v51_v10 = vrot.slane %v50_v8, 4  ;;  %v64_v11 = vsel %vm42_vm0, %v37_v6, 0.0  ;;  %v36_v12 = vld.sshfl [vmem:[#allocation1 + $0x10] sm:$0xff pattern:$0x75316420] }
  0x13   :  { %v65_v13 = vrot.slane %v64_v11, 4  ;;  %v57_v14 = vsel %vm42_vm0, %v36_v12, 0.0 }
  0x14   :  { %v45_v15 = vadd.f32 %v44_v9, %v43_v7  ;;  %v52_v16 = vadd.f32 %v51_v10, %v50_v8  ;;  %v58_v17 = vrot.slane %v57_v14, 4 }
  0x15   :  { %v66_v18 = vadd.f32 %v65_v13, %v64_v11 }
  0x16   :  { %v46_v19 = vrot.slane %v45_v15, 2  ;;  %v53_v20 = vrot.slane %v52_v16, 2  ;;  %v59_v21 = vadd.f32 %v58_v17, %v57_v14 }
  0x17   :  { %v67_v22 = vrot.slane %v66_v18, 2 }
  0x18   :  { %v47_v23 = vadd.f32 %v46_v19, %v45_v15  ;;  %v54_v24 = vadd.f32 %v53_v20, %v52_v16  ;;  %v60_v25 = vrot.slane %v59_v21, 2 }
  0x19   :  { %v68_v26 = vadd.f32 %v67_v22, %v66_v18 }
  0x1a   :  { %v48_v27 = vrot.slane %v47_v23, 1  ;;  %v55_v28 = vrot.slane %v54_v24, 1  ;;  %v61_v29 = vadd.f32 %v60_v25, %v59_v21 }
  0x1b   :  { %v69_v30 = vrot.slane %v68_v26, 1 }
  0x1c   :  { %v49_v31 = vadd.f32 %v48_v27, %v47_v23  ;;  %v56_v32 = vadd.f32 %v55_v28, %v54_v24  ;;  %v62_v33 = vrot.slane %v61_v29, 1 }
  0x1d   :  { %v70_v34 = vadd.f32 %v69_v30, %v68_v26 }
  0x1e   :  { %v71_v35 = vmul.f32 0.25, %v49_v31  ;;  %v72_v36 = vmul.f32 0.25, %v56_v32  ;;  %v63_v37 = vadd.f32 %v62_v33, %v61_v29 }
  0x1f   :  { %v74_v38 = vmul.f32 0.25, %v70_v34 }
  0x20   :  { %v75_v39 = vadd.f32 1e-08, %v71_v35  ;;  %v76_v40 = vadd.f32 1e-08, %v72_v36  ;;  %v73_v41 = vmul.f32 0.25, %v63_v37 }
  0x21   :  { %v78_v42 = vadd.f32 1e-08, %v74_v38 }
  0x22   :  { %156 = vrsqrt.f32 %v75_v39  ;;  %v77_v43 = vadd.f32 1e-08, %v73_v41  ;;  %vm95_vm3 = vweird.f32 %v76_v40  ;;  %vm85_vm5 = vweird.f32 %v75_v39 }
  0x23   :  { %158 = vrsqrt.f32 %v76_v40  ;;  %vm115_vm7 = vweird.f32 %v78_v42 }
  0x24   :  { %160 = vrsqrt.f32 %v77_v43  ;;  %vm105_vm11 = vweird.f32 %v77_v43 }
  0x25   :  { %162 = vrsqrt.f32 %v78_v42 }
  0x28   :  { %v157_v44 = vpop.eup %156 }
  0x29   :  { %v159_v45 = vpop.eup %158  ;;  %v80_v46 = vmul.f32 %v157_v44, %v75_v39  ;;  %vm86_vm2 = vweird.f32 %v157_v44 }
  0x2a   :  { %v161_v47 = vpop.eup %160  ;;  %v90_v48 = vmul.f32 %v159_v45, %v76_v40  ;;  %vm96_vm1 = vweird.f32 %v159_v45  ;;  %vm87_vm8 = vmor %vm85_vm5, %vm86_vm2 }
  0x2b   :  { %v163_v49 = vpop.eup %162  ;;  %v81_v50 = vmul.f32 %v157_v44, %v80_v46  ;;  %v100_v51 = vmul.f32 %v161_v47, %v77_v43  ;;  %vm97_vm6 = vmor %vm95_vm3, %vm96_vm1  ;;  %vm106_vm9 = vweird.f32 %v161_v47 }
  0x2c   :  { %v91_v52 = vmul.f32 %v159_v45, %v90_v48  ;;  %v110_v53 = vmul.f32 %v163_v49, %v78_v42  ;;  %vm116_vm4 = vweird.f32 %v163_v49  ;;  %vm107_vm12 = vmor %vm105_vm11, %vm106_vm9 }
  0x2d   :  { %v82_v54 = vmul.f32 0.5, %v81_v50  ;;  %v101_v55 = vmul.f32 %v161_v47, %v100_v51  ;;  %vm117_vm10 = vmor %vm115_vm7, %vm116_vm4 }
  0x2e   :  { %v92_v56 = vmul.f32 0.5, %v91_v52  ;;  %v111_v57 = vmul.f32 %v163_v49, %v110_v53 }
  0x2f   :  { %v83_v58 = vsub.f32 1.5, %v82_v54  ;;  %v102_v59 = vmul.f32 0.5, %v101_v55 }
  0x30   :  { %v93_v60 = vsub.f32 1.5, %v92_v56  ;;  %v112_v61 = vmul.f32 0.5, %v111_v57 }
  0x31   :  { %v103_v62 = vsub.f32 1.5, %v102_v59  ;;  %v84_v63 = vmul.f32 %v157_v44, %v83_v58 }
  0x32   :  { %v94_v2 = vmul.f32 %v159_v45, %v93_v60  ;;  %v113_v3 = vsub.f32 1.5, %v112_v61 }
  0x33   :  { %v104_v5 = vmul.f32 %v161_v47, %v103_v62  ;;  %v88_v8 = vsel %vm87_vm8, %v157_v44, %v84_v63 }
  0x34   :  { %v98_v4 = vsel %vm97_vm6, %v159_v45, %v94_v2  ;;  %v114_v6 = vmul.f32 %v163_v49, %v113_v3 }
  0x35   :  { %v123_v7 = vrot.slane %v98_v4, 4  ;;  %v108_v13 = vsel %vm107_vm12, %v161_v47, %v104_v5 }
  0x36   :  { %v118_v9 = vsel %vm117_vm10, %v163_v49, %v114_v6 }
  0x37   :  { %v125_v10 = vsel %vm42_vm0, %v88_v8, %v123_v7  ;;  %v124_v11 = vrot.slane %v118_v9, 4 }
  0x38   :  { %v129_v12 = vmul.f32 %v125_v10, %v236_v0 }
  0x39   :  { %v126_v14 = vsel %vm42_vm0, %v108_v13, %v124_v11 }
  0x3a   :  { %131 = vst [vmem:[#allocation5] sm:$0xff] %v129_v12  ;;  %v130_v15 = vmul.f32 %v126_v14, %v238_v1 }
  0x3c   :  { %132 = vst [vmem:[#allocation5 + $0x8] sm:$0xff] %v130_v15 }
  0x3d   :  { %145 = dma.vmem_to_hbm [thread:$0]  %s138_s13, 256, %s140_s16, [#allocation4], %s217_s11, %s217_s11, %s218_s12  }
  0x3e   :  { %214 = dma.done.wait [#allocation4], 256  }
  0x3f   :  { %215 = vsyncadd [#allocation4], 4294967040 }
  0x40   :  { %150 = vsyncpa [#allocation3], 1 }
  0x41   :  { %151 = vsyncpa [#allocation4], 1 }

</bundles_post_ra>
